<compile_context>
chip_gen: v6e
topology: v6e:2x2x1
jax: 0.10.0
libtpu: 0.0.40
codegen_flags: <defaults>
</compile_context>

<pallas_src>
import jax
import jax.numpy as jnp
import numpy as np
from jax.experimental import pallas as pl
from jax.experimental.pallas import tpu as pltpu


# ---------------------------------------------------------------------------
# Fused Pallas kernel: one batch element per grid step.
# ---------------------------------------------------------------------------
def _r2p1d_stem_kernel(x_ref, ws_ref, b1_ref, wt_ref, b2_ref, o_ref, y1_ref):
    """Fused (2+1)D stem for ONE batch element.

    x_ref : (T, H, Kpre)           bf16  pre-shifted spatial row taps folded onto lanes
    ws_ref: (Kpre, W*C_mid)        bf16  K-folded banded spatial weights (BN1 folded)
    b1_ref: (1, W*C_mid)           f32   BN1 bias tiled over W
    wt_ref: (3, W*C_mid, W*C_out)  bf16  block-diagonal temporal weights (BN2 folded)
    b2_ref: (1, W*C_out)           f32   BN2 bias tiled over W
    o_ref : (T, H, W*C_out)        f32   output
    y1_ref: (T+2, H, W*C_mid)      bf16  VMEM scratch for stage-1 activations (+halo)
    """
    T, H, Kpre = x_ref.shape
    Wmid = y1_ref.shape[2]
    Wout = o_ref.shape[2]
    M = T * H

    # Zero the temporal halo rows (temporal conv uses zero padding along T).
    # NOTE: keep this unconditional per grid step (no pl.when on program_id) so it is
    # correct under megacore "parallel" sharding on v7x.
    zeros_mid = jnp.zeros((H, Wmid), dtype=y1_ref.dtype)
    y1_ref[0] = zeros_mid
    y1_ref[T + 1] = zeros_mid

    # ---- Stage 1: spatial 1x3x3 conv + folded BN1 + ReLU -> VMEM scratch ----
    # The three kh row taps are pre-concatenated on the lane dim by the wrapper, so a
    # single (T*H, Kpre) x (Kpre, W*C_mid) dot realizes all 3 row taps, all 3 column
    # taps (banded weights) and the C_in->C_mid mix with MXU-internal K-accumulation.
    x_all = x_ref[...].reshape(M, Kpre)
    acc1 = jnp.dot(x_all, ws_ref[...], preferred_element_type=jnp.float32)
    y1 = jnp.maximum(acc1 + b1_ref[...], 0.0)
    y1_ref[pl.ds(1, T)] = y1.reshape(T, H, Wmid).astype(y1_ref.dtype)

    # ---- Stage 2: temporal 3x1x1 conv + folded BN2 + ReLU -> output ----
    # Scratch index s holds frame s-1; output frame t uses scratch rows t..t+2, so
    # temporal tap dt reads the length-T scratch window starting at dt (batched dot).
    acc2 = jnp.dot(y1_ref[pl.ds(0, T)].reshape(M, Wmid), wt_ref[0],
                   preferred_element_type=jnp.float32)
    acc2 = acc2 + jnp.dot(y1_ref[pl.ds(1, T)].reshape(M, Wmid), wt_ref[1],
                          preferred_element_type=jnp.float32)
    acc2 = acc2 + jnp.dot(y1_ref[pl.ds(2, T)].reshape(M, Wmid), wt_ref[2],
                          preferred_element_type=jnp.float32)
    y2 = jnp.maximum(acc2 + b2_ref[...], 0.0)
    o_ref[...] = y2.reshape(T, H, Wout).astype(o_ref.dtype)


# ---------------------------------------------------------------------------
# Parameter-only preprocessing (hoisted out of the per-forward path).
# ---------------------------------------------------------------------------
def fold_bn(gamma, beta, running_mean, running_var, eps=1e-5):
    scale = gamma / jnp.sqrt(running_var + eps)
    bias = beta - running_mean * scale
    return scale, bias


def _round_up(x, m):
    return ((x + m - 1) // m) * m


def prepare_features_params(params, W):
    """Build the K-folded banded weights / folded-BN biases once (depends only on
    the module parameters and the spatial width W, not on the activations)."""
    w_s = params["w_spatial"]      # (C_mid, C_in, 1, 3, 3)  PyTorch OIDHW
    w_t = params["w_temporal"]     # (C_out, C_mid, 3, 1, 1)
    C_mid, C_in = w_s.shape[0], w_s.shape[1]
    C_out = w_t.shape[0]

    scale1, bias1 = fold_bn(params["bn1_gamma"], params["bn1_beta"],
                            params["bn1_mean"], params["bn1_var"])
    scale2, bias2 = fold_bn(params["bn2_gamma"], params["bn2_beta"],
                            params["bn2_mean"], params["bn2_var"])

    K1 = (W + 2) * C_in
    K1p = _round_up(K1, 16)            # per-row-tap window width in the lane dim
    Kpre = _round_up(3 * K1p, 128)     # total pre-shifted K (lane-dense, 128-aligned)

    # Banded spatial weight: ws[kh, w_in*C_in + c_in, w*C_mid + c_mid]
    #   = W_s[c_mid, c_in, 0, kh, w_in - w] * scale1[c_mid]  if 0 <= w_in - w <= 2.
    w_s_k = jnp.transpose(w_s[:, :, 0, :, :], (2, 3, 1, 0))        # (kh,kw,C_in,C_mid)
    w_s_k = w_s_k * scale1[None, None, None, :]
    band = (jnp.arange(W + 2)[:, None, None] ==
            (jnp.arange(W)[None, None, :] + jnp.arange(3)[None, :, None])
            ).astype(jnp.float32)                                  # (W+2, 3, W)
    ws_band = jnp.einsum("ukw,akcm->aucwm", band, w_s_k)
    ws_band = ws_band.reshape(3, K1, W * C_mid)
    # Fold the 3 kh row taps into a single K dimension matching the pre-shifted input.
    ws_band = jnp.pad(ws_band, ((0, 0), (0, K1p - K1), (0, 0)))
    ws_comb = ws_band.reshape(3 * K1p, W * C_mid)
    ws_comb = jnp.pad(ws_comb, ((0, Kpre - 3 * K1p), (0, 0))).astype(jnp.bfloat16)

    # Block-diagonal temporal weight: wt[dt, w'*C_mid + c_mid, w*C_out + c_out]
    #   = W_t[c_out, c_mid, dt, 0, 0] * scale2[c_out]  if w' == w.
    w_t_k = jnp.transpose(w_t[:, :, :, 0, 0], (2, 1, 0))           # (dt, C_mid, C_out)
    w_t_k = w_t_k * scale2[None, None, :]
    wt_band = jnp.einsum("uw,dmo->dumwo", jnp.eye(W, dtype=jnp.float32), w_t_k)
    wt_band = wt_band.reshape(3, W * C_mid, W * C_out).astype(jnp.bfloat16)

    b1_big = jnp.tile(bias1, W).reshape(1, W * C_mid).astype(jnp.float32)
    b2_big = jnp.tile(bias2, W).reshape(1, W * C_out).astype(jnp.float32)

    return {"ws": ws_comb, "b1": b1_big, "wt": wt_band, "b2": b2_big}


# ---------------------------------------------------------------------------
# Forward wrapper: input layout plumbing + pallas_call.
# ---------------------------------------------------------------------------
@jax.jit
def my_model_features_forward(x, prep):
    """x: (N, C_in, T, H, W) float32 -> (N, C_out, T, H, W) float32."""
    N, C_in, T, H, W = x.shape
    Kpre = prep["ws"].shape[0]
    Wmid = prep["ws"].shape[1]
    Wout = prep["wt"].shape[2]
    C_out = Wout // W

    K1 = (W + 2) * C_in
    K1p = _round_up(K1, 16)

    # Channels-last, spatial zero-pad, fold (w, c_in) onto the lane dimension.
    x_cl = jnp.transpose(x, (0, 2, 3, 4, 1))                       # (N,T,H,W,C_in)
    x_pad = jnp.pad(x_cl, ((0, 0), (0, 0), (1, 1), (1, 1), (0, 0)))
    x_lin = x_pad.reshape(N, T, H + 2, K1)
    x_lin = jnp.pad(x_lin, ((0, 0), (0, 0), (0, 0), (0, K1p - K1)))
    # Pre-shift the three spatial row taps onto the lane dim (K-fold for stage 1).
    x_pre = jnp.concatenate([x_lin[:, :, kh:kh + H, :] for kh in range(3)], axis=-1)
    x_pre = jnp.pad(x_pre, ((0, 0), (0, 0), (0, 0), (0, Kpre - 3 * K1p)))
    x_pre = x_pre.astype(jnp.bfloat16)                             # (N, T, H, Kpre)

    out = pl.pallas_call(
        _r2p1d_stem_kernel,
        out_shape=jax.ShapeDtypeStruct((N, T, H, Wout), jnp.float32),
        grid_spec=pltpu.PrefetchScalarGridSpec(
            num_scalar_prefetch=0,
            grid=(N,),
            in_specs=[
                pl.BlockSpec((None, T, H, Kpre), lambda n: (n, 0, 0, 0)),
                pl.BlockSpec((Kpre, Wmid), lambda n: (0, 0)),
                pl.BlockSpec((1, Wmid), lambda n: (0, 0)),
                pl.BlockSpec((3, Wmid, Wout), lambda n: (0, 0, 0)),
                pl.BlockSpec((1, Wout), lambda n: (0, 0)),
            ],
            out_specs=pl.BlockSpec((None, T, H, Wout), lambda n: (n, 0, 0, 0)),
            scratch_shapes=[pltpu.VMEM((T + 2, H, Wmid), jnp.bfloat16)],
        ),
        compiler_params=pltpu.CompilerParams(
            dimension_semantics=("parallel",)),
    )(x_pre, prep["ws"], prep["b1"], prep["wt"], prep["b2"])

    # Back to NCDHW for module-equivalent output; downstream consumers that accept
    # channels-last could take `out` (N, T, H, W*C_out) directly and skip this.
    y2 = out.reshape(N, T, H, W, C_out)
    return jnp.transpose(y2, (0, 4, 1, 2, 3))


# ---------------------------------------------------------------------------
# Pure-JAX reference (lax.conv) for correctness check.
# ---------------------------------------------------------------------------
def reference_forward(x, params):
    dn = jax.lax.conv_dimension_numbers(x.shape, params["w_spatial"].shape,
                                        ("NCDHW", "OIDHW", "NCDHW"))
    scale1, bias1 = fold_bn(params["bn1_gamma"], params["bn1_beta"],
                            params["bn1_mean"], params["bn1_var"])
    scale2, bias2 = fold_bn(params["bn2_gamma"], params["bn2_beta"],
                            params["bn2_mean"], params["bn2_var"])
    y = jax.lax.conv_general_dilated(x, params["w_spatial"], (1, 1, 1),
                                     [(0, 0), (1, 1), (1, 1)], dimension_numbers=dn)
    y = jnp.maximum(y * scale1[None, :, None, None, None]
                    + bias1[None, :, None, None, None], 0.0)
    dn2 = jax.lax.conv_dimension_numbers(y.shape, params["w_temporal"].shape,
                                         ("NCDHW", "OIDHW", "NCDHW"))
    y = jax.lax.conv_general_dilated(y, params["w_temporal"], (1, 1, 1),
                                     [(1, 1), (0, 0), (0, 0)], dimension_numbers=dn2)
    y = jnp.maximum(y * scale2[None, :, None, None, None]
                    + bias2[None, :, None, None, None], 0.0)
    return y


def init_params(key, c_in=3, c_mid=16, c_out=8):
    ks = jax.random.split(key, 8)
    return {
        "w_spatial": 0.1 * jax.random.normal(ks[0], (c_mid, c_in, 1, 3, 3), jnp.float32),
        "w_temporal": 0.1 * jax.random.normal(ks[1], (c_out, c_mid, 3, 1, 1), jnp.float32),
        "bn1_gamma": 1.0 + 0.05 * jax.random.normal(ks[2], (c_mid,), jnp.float32),
        "bn1_beta": 0.05 * jax.random.normal(ks[3], (c_mid,), jnp.float32),
        "bn1_mean": 0.02 * jax.random.normal(ks[4], (c_mid,), jnp.float32),
        "bn1_var": jnp.abs(1.0 + 0.05 * jax.random.normal(ks[5], (c_mid,), jnp.float32)),
        "bn2_gamma": 1.0 + 0.05 * jax.random.normal(ks[6], (c_out,), jnp.float32),
        "bn2_beta": 0.05 * jax.random.normal(ks[7], (c_out,), jnp.float32),
        "bn2_mean": jnp.zeros((c_out,), jnp.float32),
        "bn2_var": jnp.ones((c_out,), jnp.float32),
    }


if __name__ == "__main__":
    key = jax.random.PRNGKey(0)
    k_x, k_p = jax.random.split(key)
    # NCDHW: batch=2, channels=3 (RGB video), T=8 frames, 16x16 spatial
    x = jax.random.normal(k_x, (2, 3, 8, 16, 16), jnp.float32)
    params = init_params(k_p)

    # Parameter-only preprocessing, done once (hoisted out of the forward path).
    prep = jax.tree.map(jax.block_until_ready,
                        prepare_features_params(params, W=x.shape[4]))

    y = jax.block_until_ready(my_model_features_forward(x, prep))
    y_ref = jax.block_until_ready(reference_forward(x, params))

    # bf16 matmul operands (fp32 MXU accumulation) -> loosened tolerance vs fp32 ref.
    np.testing.assert_allclose(np.asarray(y), np.asarray(y_ref), rtol=2e-2, atol=2e-2)

    # TODO(synk): the real pretrained `features` backbone (full R(2+1)D trunk with
    # residual stages) is not available here; this implements the canonical factorized
    # (2+1)D stem block it is built from.
    print("KERNEL_OK")
</pallas_src>

<mosaic_0001>
module attributes {stable_mosaic.version = 11 : i64} {
  func.func @_r2p1d_stem_kernel(%arg0: i32, %arg1: memref<1x8x16x256xbf16, #tpu.memory_space<vmem>>, %arg2: memref<256x256xbf16, #tpu.memory_space<vmem>>, %arg3: memref<1x256xf32, #tpu.memory_space<vmem>>, %arg4: memref<3x256x128xbf16, #tpu.memory_space<vmem>>, %arg5: memref<1x128xf32, #tpu.memory_space<vmem>>, %arg6: memref<1x8x16x128xf32, #tpu.memory_space<vmem>>, %arg7: memref<10x16x256xbf16, #tpu.memory_space<vmem>>) attributes {dimension_semantics = [#tpu.dimension_semantics<parallel>], iteration_bounds = array<i64: 2>, scalar_prefetch = 0 : i64, scratch_operands = 1 : i64, tpu.core_type = #tpu.core_type<tc>, window_params = [{transform_indices = @transform_0, window_bounds = array<i64: 1, 8, 16, 256>}, {pipeline_mode = #tpu.pipeline_mode<synchronous>, transform_indices = @transform_1, window_bounds = array<i64: 256, 256>}, {pipeline_mode = #tpu.pipeline_mode<synchronous>, transform_indices = @transform_2, window_bounds = array<i64: 1, 256>}, {pipeline_mode = #tpu.pipeline_mode<synchronous>, transform_indices = @transform_3, window_bounds = array<i64: 3, 256, 128>}, {pipeline_mode = #tpu.pipeline_mode<synchronous>, transform_indices = @transform_4, window_bounds = array<i64: 1, 128>}, {transform_indices = @transform_5, window_bounds = array<i64: 1, 8, 16, 128>}]} {
    %cst = arith.constant 0.000000e+00 : bf16
    %0 = vector.broadcast %cst : bf16 to vector<16x256xbf16>
    %c0 = arith.constant 0 : index
    %c0_0 = arith.constant 0 : index
    %c0_1 = arith.constant 0 : index
    %1 = vector.load %arg7[%c0, %c0_0, %c0_1] : memref<10x16x256xbf16, #tpu.memory_space<vmem>>, vector<1x16x256xbf16>
    %2 = vector.shape_cast %1 : vector<1x16x256xbf16> to vector<16x256xbf16>
    %3 = vector.shape_cast %0 : vector<16x256xbf16> to vector<1x16x256xbf16>
    tpu.vector_store %arg7[%c0, %c0_0, %c0_1], %3 {strides = array<i32>} : memref<10x16x256xbf16, #tpu.memory_space<vmem>>, vector<1x16x256xbf16>,
    %c9 = arith.constant 9 : index
    %c0_2 = arith.constant 0 : index
    %c0_3 = arith.constant 0 : index
    %4 = vector.load %arg7[%c9, %c0_2, %c0_3] : memref<10x16x256xbf16, #tpu.memory_space<vmem>>, vector<1x16x256xbf16>
    %5 = vector.shape_cast %4 : vector<1x16x256xbf16> to vector<16x256xbf16>
    %6 = vector.shape_cast %0 : vector<16x256xbf16> to vector<1x16x256xbf16>
    tpu.vector_store %arg7[%c9, %c0_2, %c0_3], %6 {strides = array<i32>} : memref<10x16x256xbf16, #tpu.memory_space<vmem>>, vector<1x16x256xbf16>,
    %c0_4 = arith.constant 0 : index
    %c0_5 = arith.constant 0 : index
    %c0_6 = arith.constant 0 : index
    %c0_7 = arith.constant 0 : index
    %7 = vector.load %arg1[%c0_4, %c0_5, %c0_6, %c0_7] : memref<1x8x16x256xbf16, #tpu.memory_space<vmem>>, vector<1x8x16x256xbf16>
    %8 = vector.shape_cast %7 : vector<1x8x16x256xbf16> to vector<8x16x256xbf16>
    %9 = vector.shape_cast %8 : vector<8x16x256xbf16> to vector<128x256xbf16>
    %c0_8 = arith.constant 0 : index
    %c0_9 = arith.constant 0 : index
    %10 = vector.load %arg2[%c0_8, %c0_9] : memref<256x256xbf16, #tpu.memory_space<vmem>>, vector<256x256xbf16>
    %cst_10 = arith.constant dense<0.000000e+00> : vector<128x256xf32>
    %11 = tpu.matmul %9, %10, %cst_10 {dimension_numbers = #tpu.dot_dimension_numbers<[1], [0], [0], [1], [0, 0, 1, 1], [], []>} : vector<128x256xbf16>, vector<256x256xbf16>, vector<128x256xf32> -> vector<128x256xf32>
    %c0_11 = arith.constant 0 : index
    %c0_12 = arith.constant 0 : index
    %12 = vector.load %arg3[%c0_11, %c0_12] : memref<1x256xf32, #tpu.memory_space<vmem>>, vector<1x256xf32>
    %13 = vector.broadcast %12 : vector<1x256xf32> to vector<128x256xf32>
    %14 = arith.addf %11, %13 : vector<128x256xf32>
    %cst_13 = arith.constant 0.000000e+00 : f32
    %15 = vector.broadcast %cst_13 : f32 to vector<128x256xf32>
    %16 = arith.maximumf %14, %15 : vector<128x256xf32>
    %17 = vector.shape_cast %16 : vector<128x256xf32> to vector<8x16x256xf32>
    %18 = arith.truncf %17 : vector<8x16x256xf32> to vector<8x16x256xbf16>
    %c1 = arith.constant 1 : index
    %c0_14 = arith.constant 0 : index
    %c0_15 = arith.constant 0 : index
    %19 = vector.load %arg7[%c1, %c0_14, %c0_15] : memref<10x16x256xbf16, #tpu.memory_space<vmem>>, vector<8x16x256xbf16>
    tpu.vector_store %arg7[%c1, %c0_14, %c0_15], %18 {strides = array<i32>} : memref<10x16x256xbf16, #tpu.memory_space<vmem>>, vector<8x16x256xbf16>,
    %c0_16 = arith.constant 0 : index
    %c0_17 = arith.constant 0 : index
    %c0_18 = arith.constant 0 : index
    %20 = vector.load %arg7[%c0_16, %c0_17, %c0_18] : memref<10x16x256xbf16, #tpu.memory_space<vmem>>, vector<8x16x256xbf16>
    %21 = vector.shape_cast %20 : vector<8x16x256xbf16> to vector<128x256xbf16>
    %c0_19 = arith.constant 0 : index
    %c0_20 = arith.constant 0 : index
    %c0_21 = arith.constant 0 : index
    %22 = vector.load %arg4[%c0_19, %c0_20, %c0_21] : memref<3x256x128xbf16, #tpu.memory_space<vmem>>, vector<1x256x128xbf16>
    %23 = vector.shape_cast %22 : vector<1x256x128xbf16> to vector<256x128xbf16>
    %cst_22 = arith.constant dense<0.000000e+00> : vector<128x128xf32>
    %24 = tpu.matmul %21, %23, %cst_22 {dimension_numbers = #tpu.dot_dimension_numbers<[1], [0], [0], [1], [0, 0, 1, 1], [], []>} : vector<128x256xbf16>, vector<256x128xbf16>, vector<128x128xf32> -> vector<128x128xf32>
    %c1_23 = arith.constant 1 : index
    %c0_24 = arith.constant 0 : index
    %c0_25 = arith.constant 0 : index
    %25 = vector.load %arg7[%c1_23, %c0_24, %c0_25] : memref<10x16x256xbf16, #tpu.memory_space<vmem>>, vector<8x16x256xbf16>
    %26 = vector.shape_cast %25 : vector<8x16x256xbf16> to vector<128x256xbf16>
    %c1_26 = arith.constant 1 : index
    %c0_27 = arith.constant 0 : index
    %c0_28 = arith.constant 0 : index
    %27 = vector.load %arg4[%c1_26, %c0_27, %c0_28] : memref<3x256x128xbf16, #tpu.memory_space<vmem>>, vector<1x256x128xbf16>
    %28 = vector.shape_cast %27 : vector<1x256x128xbf16> to vector<256x128xbf16>
    %cst_29 = arith.constant dense<0.000000e+00> : vector<128x128xf32>
    %29 = tpu.matmul %26, %28, %cst_29 {dimension_numbers = #tpu.dot_dimension_numbers<[1], [0], [0], [1], [0, 0, 1, 1], [], []>} : vector<128x256xbf16>, vector<256x128xbf16>, vector<128x128xf32> -> vector<128x128xf32>
    %30 = arith.addf %24, %29 : vector<128x128xf32>
    %c2 = arith.constant 2 : index
    %c0_30 = arith.constant 0 : index
    %c0_31 = arith.constant 0 : index
    %31 = vector.load %arg7[%c2, %c0_30, %c0_31] : memref<10x16x256xbf16, #tpu.memory_space<vmem>>, vector<8x16x256xbf16>
    %32 = vector.shape_cast %31 : vector<8x16x256xbf16> to vector<128x256xbf16>
    %c2_32 = arith.constant 2 : index
    %c0_33 = arith.constant 0 : index
    %c0_34 = arith.constant 0 : index
    %33 = vector.load %arg4[%c2_32, %c0_33, %c0_34] : memref<3x256x128xbf16, #tpu.memory_space<vmem>>, vector<1x256x128xbf16>
    %34 = vector.shape_cast %33 : vector<1x256x128xbf16> to vector<256x128xbf16>
    %cst_35 = arith.constant dense<0.000000e+00> : vector<128x128xf32>
    %35 = tpu.matmul %32, %34, %cst_35 {dimension_numbers = #tpu.dot_dimension_numbers<[1], [0], [0], [1], [0, 0, 1, 1], [], []>} : vector<128x256xbf16>, vector<256x128xbf16>, vector<128x128xf32> -> vector<128x128xf32>
    %36 = arith.addf %30, %35 : vector<128x128xf32>
    %c0_36 = arith.constant 0 : index
    %c0_37 = arith.constant 0 : index
    %37 = vector.load %arg5[%c0_36, %c0_37] : memref<1x128xf32, #tpu.memory_space<vmem>>, vector<1x128xf32>
    %38 = vector.broadcast %37 : vector<1x128xf32> to vector<128x128xf32>
    %39 = arith.addf %36, %38 : vector<128x128xf32>
    %cst_38 = arith.constant 0.000000e+00 : f32
    %40 = vector.broadcast %cst_38 : f32 to vector<128x128xf32>
    %41 = arith.maximumf %39, %40 : vector<128x128xf32>
    %42 = vector.shape_cast %41 : vector<128x128xf32> to vector<8x16x128xf32>
    %c0_39 = arith.constant 0 : index
    %c0_40 = arith.constant 0 : index
    %c0_41 = arith.constant 0 : index
    %c0_42 = arith.constant 0 : index
    %43 = vector.load %arg6[%c0_39, %c0_40, %c0_41, %c0_42] : memref<1x8x16x128xf32, #tpu.memory_space<vmem>>, vector<1x8x16x128xf32>
    %44 = vector.shape_cast %43 : vector<1x8x16x128xf32> to vector<8x16x128xf32>
    %45 = vector.shape_cast %42 : vector<8x16x128xf32> to vector<1x8x16x128xf32>
    tpu.vector_store %arg6[%c0_39, %c0_40, %c0_41, %c0_42], %45 {strides = array<i32>} : memref<1x8x16x128xf32, #tpu.memory_space<vmem>>, vector<1x8x16x128xf32>,
    return
  }
  func.func @transform_0(%arg0: i32) -> (i32, i32, i32, i32) {
    %c0_i32 = arith.constant 0 : i32
    %c0_i32_0 = arith.constant 0 : i32
    %c0_i32_1 = arith.constant 0 : i32
    %c0_i32_2 = arith.constant 0 : i32
    return %arg0, %c0_i32, %c0_i32_0, %c0_i32_1 : i32, i32, i32, i32
  }
  func.func @transform_1(%arg0: i32) -> (i32, i32) {
    %c0_i32 = arith.constant 0 : i32
    %c0_i32_0 = arith.constant 0 : i32
    %c0_i32_1 = arith.constant 0 : i32
    return %c0_i32, %c0_i32_0 : i32, i32
  }
  func.func @transform_2(%arg0: i32) -> (i32, i32) {
    %c0_i32 = arith.constant 0 : i32
    %c0_i32_0 = arith.constant 0 : i32
    %c0_i32_1 = arith.constant 0 : i32
    return %c0_i32, %c0_i32_0 : i32, i32
  }
  func.func @transform_3(%arg0: i32) -> (i32, i32, i32) {
    %c0_i32 = arith.constant 0 : i32
    %c0_i32_0 = arith.constant 0 : i32
    %c0_i32_1 = arith.constant 0 : i32
    %c0_i32_2 = arith.constant 0 : i32
    return %c0_i32, %c0_i32_0, %c0_i32_1 : i32, i32, i32
  }
  func.func @transform_4(%arg0: i32) -> (i32, i32) {
    %c0_i32 = arith.constant 0 : i32
    %c0_i32_0 = arith.constant 0 : i32
    %c0_i32_1 = arith.constant 0 : i32
    return %c0_i32, %c0_i32_0 : i32, i32
  }
  func.func @transform_5(%arg0: i32) -> (i32, i32, i32, i32) {
    %c0_i32 = arith.constant 0 : i32
    %c0_i32_0 = arith.constant 0 : i32
    %c0_i32_1 = arith.constant 0 : i32
    %c0_i32_2 = arith.constant 0 : i32
    return %arg0, %c0_i32, %c0_i32_0, %c0_i32_1 : i32, i32, i32, i32
  }
}

</mosaic_0001>

<bundles_post_ra>
// kernel: my_model_features_forward.1
= control target key start
LH: loop header
LB: loop body
LE: loop exit
PB: predicated region body
PF: predicated region fallthrough
CT: control target
= control target key end

     0   :  { %s2527_s18 = smov 0   ;;  %s3057_s0 = inlined_call_operand.vmem [shape: bf16[2,8,16,256], index: 0, kind: input, shape index: {}]   ;;  %s3058_s1 = inlined_call_operand.vmem [shape: bf16[256,256], index: 1, kind: input, shape index: {}]   ;;  %s3059_s2 = inlined_call_operand.vmem [shape: f32[1,256], index: 2, kind: input, shape index: {}]   ;;  %s3060_s3 = inlined_call_operand.vmem [shape: bf16[3,256,128], index: 3, kind: input, shape index: {}]   ;;  %s3061_s4 = inlined_call_operand.vmem [shape: f32[1,128], index: 4, kind: input, shape index: {}]   ;;  %s3062_s5 = inlined_call_operand.vmem [shape: f32[2,8,16,128], index: 5, kind: output, shape index: {}]  }
   0x1 LB: > { %s1881_s19 = sadd.s32 4294967295, %s2494_s18   ;;  %p1885_p0 = scmp.ge.s32.totalorder %s2494_s18, 1  ;;  %s2494_s18 = sphi %s2527_s18, %s15_s18  }
   0x2   : > { %p187_p1 = scmp.lt.s32.totalorder %s2494_s18, 3 }
   0x4   : > { %p188_p2 = pnand %p1885_p0, %p187_p1 }
   0x5   : > { %p215_p3 = scmp.lt.s32.totalorder (!%p188_p2), %s1881_s19, 1 }
   0x6   : > { %191 = sbr.rel (%p188_p2) target bundleno = 626 (0x272), region = 40 }
   0xb   : > { %v2368_v0 = vld [vmem:[%s3058_s1 + $0x74] ss:$8 sps:$4 sm:$0xff]   ;;  %v2370_v1 = vld [vmem:[%s3058_s1 + $0x70] ss:$8 sps:$4 sm:$0xff]   ;;  %v2371_v2 = vld [vmem:[%s3058_s1 + $0x64] ss:$8 sps:$4 sm:$0xff]  }
   0xc   : > { %531 = vmatprep.subr.bf16.mxu0 %v2368_v0  ;;  %v2373_v3 = vld [vmem:[%s3058_s1 + $0x60] ss:$8 sps:$4 sm:$0xff]   ;;  %v2374_v4 = vld [vmem:[%s3058_s1 + $0x54] ss:$8 sps:$4 sm:$0xff]   ;;  %v2376_v5 = vld [vmem:[%s3058_s1 + $0x50] ss:$8 sps:$4 sm:$0xff]  }
   0xd   : > { %532 = vmatpush1.bf16.msra.mxu0 %v2370_v1  ;;  %v2377_v6 = vld [vmem:[%s3058_s1 + $0x44] ss:$8 sps:$4 sm:$0xff]   ;;  %v2379_v7 = vld [vmem:[%s3058_s1 + $0x40] ss:$8 sps:$4 sm:$0xff]   ;;  %v2380_v8 = vld [vmem:[%s3058_s1 + $0x34] ss:$8 sps:$4 sm:$0xff]  }
   0xe   : > { %533 = vmatprep.subr.bf16.mxu0 %v2371_v2  ;;  %s3064_s19 = smov (!%p215_p3, %s1881_s19), 1  ;;  %v2382_v9 = vld [vmem:[%s3058_s1 + $0x30] ss:$8 sps:$4 sm:$0xff]   ;;  %v2383_v10 = vld [vmem:[%s3058_s1 + $0x24] ss:$8 sps:$4 sm:$0xff]  }
   0xf   : > { %s2117_s17 = sshll.u32 %s3064_s19, 7  ;;  %v2385_v11 = vld [vmem:[%s3058_s1 + $0x20] ss:$8 sps:$4 sm:$0xff]   ;;  %v2386_v12 = vld [vmem:[%s3058_s1 + $0x14] ss:$8 sps:$4 sm:$0xff]  }
  0x10   : > { %s2579_s24 = scalar_lea.vmem %s3057_s0, %s2117_s17  ;;  %v2388_v14 = vld [vmem:[%s3058_s1 + $0x10] ss:$8 sps:$4 sm:$0xff]   ;;  %v2389_v15 = vld [vmem:[%s3058_s1 + $0x4] ss:$8 sps:$4 sm:$0xff]   ;;  %v2391_v16 = vld [vmem:[%s3058_s1] ss:$8 sps:$4 sm:$0xff]   ;;  %s3007_s13 = scalar_lea.vmem %s3062_s5, %s2117_s17 }
  0x11   : > { %534 = vmatpush1.bf16.msra.mxu0 %v2373_v3  ;;  %v2418_v13 = vld [vmem:[%s2579_s24 + $0x4] ss:$8 sps:$4 sm:$0xff]   ;;  %v2392_v17 = vld [vmem:[%s3058_s1 + $0xf4] ss:$8 sps:$4 sm:$0xff]   ;;  %v2394_v18 = vld [vmem:[%s3058_s1 + $0xf0] ss:$8 sps:$4 sm:$0xff]  }
  0x12   : > { %535 = vmatprep.subr.bf16.mxu0 %v2374_v4  ;;  %563 = vmatprep.mubr.bf16.mxu0 %v2418_v13  ;;  %v2395_v19 = vld [vmem:[%s3058_s1 + $0xe4] ss:$8 sps:$4 sm:$0xff]   ;;  %v2440_v20 = vld [vmem:[%s3060_s3 + $0xf8] sm:$0xff]   ;;  %v2397_v21 = vld [vmem:[%s3058_s1 + $0xe0] ss:$8 sps:$4 sm:$0xff]  }
  0x13   : > { %v2441_v22 = vld [vmem:[%s3060_s3 + $0xb8] sm:$0xff]   ;;  %2151 = vmatprep.subr.bf16.mxu1 %v2440_v20  ;;  %v2442_v24 = vld [vmem:[%s3060_s3 + $0xf0] sm:$0xff]   ;;  %v2444_v26 = vld [vmem:[%s3060_s3 + $0xe8] sm:$0xff]  }
  0x14   : > { %v2398_v23 = vld [vmem:[%s3058_s1 + $0xd4] ss:$8 sps:$4 sm:$0xff]   ;;  %2152 = vmatpush3.bf16.msra.mxu1 %v2441_v22  ;;  %v2400_v27 = vld [vmem:[%s3058_s1 + $0xd0] ss:$8 sps:$4 sm:$0xff]   ;;  %v2401_v28 = vld [vmem:[%s3058_s1 + $0xc4] ss:$8 sps:$4 sm:$0xff]  }
  0x15   : > { %536 = vmatpush1.bf16.msra.mxu0 %v2376_v5  ;;  %v2443_v25 = vld [vmem:[%s3060_s3 + $0xb0] sm:$0xff]   ;;  %2153 = vmatprep.subr.bf16.mxu1 %v2442_v24  ;;  %v2445_v29 = vld [vmem:[%s3060_s3 + $0xa8] sm:$0xff]   ;;  %v2448_v30 = vld [vmem:[%s3060_s3 + $0xe0] sm:$0xff]  }
  0x16   : > { %537 = vmatprep.subr.bf16.mxu0 %v2377_v6  ;;  %v2403_v31 = vld [vmem:[%s3058_s1 + $0xc0] ss:$8 sps:$4 sm:$0xff]   ;;  %v2404_v32 = vld [vmem:[%s3058_s1 + $0xb4] ss:$8 sps:$4 sm:$0xff]   ;;  %v2406_v35 = vld [vmem:[%s3058_s1 + $0xb0] ss:$8 sps:$4 sm:$0xff]  }
  0x17   : > { %v2449_v33 = vld [vmem:[%s3060_s3 + $0xa0] sm:$0xff]   ;;  %v2452_v34 = vld [vmem:[%s3060_s3 + $0xd8] sm:$0xff]   ;;  %v2687_v47 = vld [vmem:[%s3060_s3 + $0x170] sm:$0xff]  }
  0x18   : > { %2154 = vmatpush3.bf16.msra.mxu1 %v2443_v25  ;;  %v2453_v36 = vld [vmem:[%s3060_s3 + $0x98] sm:$0xff]   ;;  %v2407_v37 = vld [vmem:[%s3058_s1 + $0xa4] ss:$8 sps:$4 sm:$0xff]   ;;  %v2409_v38 = vld [vmem:[%s3058_s1 + $0xa0] ss:$8 sps:$4 sm:$0xff]  }
  0x19   : > { %538 = vmatpush1.bf16.msra.mxu0 %v2379_v7  ;;  %2155 = vmatprep.subr.bf16.mxu1 %v2444_v26  ;;  %v2410_v39 = vld [vmem:[%s3058_s1 + $0x94] ss:$8 sps:$4 sm:$0xff]   ;;  %v2412_v40 = vld [vmem:[%s3058_s1 + $0x90] ss:$8 sps:$4 sm:$0xff]   ;;  %v2413_v41 = vld [vmem:[%s3058_s1 + $0x84] ss:$8 sps:$4 sm:$0xff]  }
  0x1a   : > { %539 = vmatprep.subr.bf16.mxu0 %v2380_v8  ;;  %v2415_v42 = vld [vmem:[%s3058_s1 + $0x80] ss:$8 sps:$4 sm:$0xff]   ;;  %v2675_v43 = vld [vmem:[%s3060_s3 + $0x178] sm:$0xff]   ;;  %v2693_v48 = vld [vmem:[%s3060_s3 + $0x130] sm:$0xff]  }
  0x1b   : > { %v2416_v44 = vld [vmem:[%s2579_s24] ss:$8 sps:$4 sm:$0xff]   ;;  %v2419_v45 = vld [vmem:[%s2579_s24 + $0x14] ss:$8 sps:$4 sm:$0xff]   ;;  %v2421_v50 = vld [vmem:[%s2579_s24 + $0x10] ss:$8 sps:$4 sm:$0xff]  }
  0x1c   : > { %2156 = vmatpush3.bf16.msra.mxu1 %v2445_v29  ;;  %v2682_v46 = vld [vmem:[%s3060_s3 + $0x138] sm:$0xff]   ;;  %v2698_v49 = vld [vmem:[%s3060_s3 + $0x168] sm:$0xff]   ;;  %v2456_v0 = vld [vmem:[%s3060_s3 + $0xd0] sm:$0xff]  }
  0x1d   : > { %540 = vmatpush1.bf16.msra.mxu0 %v2382_v9  ;;  %2157 = vmatprep.subr.bf16.mxu1 %v2448_v30  ;;  %v2422_v51 = vld [vmem:[%s2579_s24 + $0x24] ss:$8 sps:$4 sm:$0xff]   ;;  %v2424_v53 = vld [vmem:[%s2579_s24 + $0x20] ss:$8 sps:$4 sm:$0xff]   ;;  %v2425_v54 = vld [vmem:[%s2579_s24 + $0x34] ss:$8 sps:$4 sm:$0xff]  }
  0x1e   : > { %541 = vmatprep.subr.bf16.mxu0 %v2383_v10  ;;  %v2708_v52 = vld [vmem:[%s3060_s3 + $0x128] sm:$0xff]   ;;  %v2427_v55 = vld [vmem:[%s2579_s24 + $0x30] ss:$8 sps:$4 sm:$0xff]   ;;  %v2431_v58 = vld [vmem:[%s2579_s24 + $0x54] ss:$8 sps:$4 sm:$0xff]  }
  0x1f   : > { %v2428_v56 = vld [vmem:[%s2579_s24 + $0x44] ss:$8 sps:$4 sm:$0xff]   ;;  %v2430_v57 = vld [vmem:[%s2579_s24 + $0x40] ss:$8 sps:$4 sm:$0xff]   ;;  %v2433_v59 = vld [vmem:[%s2579_s24 + $0x50] ss:$8 sps:$4 sm:$0xff]  }
  0x20   : > { %2158 = vmatpush3.bf16.msra.mxu1 %v2449_v33  ;;  %v2434_v60 = vld [vmem:[%s2579_s24 + $0x64] ss:$8 sps:$4 sm:$0xff]   ;;  %v2436_v61 = vld [vmem:[%s2579_s24 + $0x60] ss:$8 sps:$4 sm:$0xff]   ;;  %v2437_v62 = vld [vmem:[%s2579_s24 + $0x74] ss:$8 sps:$4 sm:$0xff]  }
  0x21   : > { %542 = vmatpush1.bf16.msra.mxu0 %v2385_v11  ;;  %2159 = vmatprep.subr.bf16.mxu1 %v2452_v34  ;;  %v2439_v63 = vld [vmem:[%s2579_s24 + $0x70] ss:$8 sps:$4 sm:$0xff]   ;;  %v2729_v1 = vld [vmem:[%s3060_s3 + $0x160] sm:$0xff]   ;;  %v2460_v4 = vld [vmem:[%s3060_s3 + $0xc8] sm:$0xff]  }
  0x22   : > { %543 = vmatprep.subr.bf16.mxu0 %v2386_v12  ;;  %v2457_v2 = vld [vmem:[%s3060_s3 + $0x90] sm:$0xff]   ;;  %v2737_v3 = vld [vmem:[%s3060_s3 + $0x120] sm:$0xff]   ;;  %v2747_v5 = vld [vmem:[%s3060_s3 + $0x158] sm:$0xff]  }
  0x23   : > { %v2461_v6 = vld [vmem:[%s3060_s3 + $0x88] sm:$0xff]   ;;  %v2755_v7 = vld [vmem:[%s3060_s3 + $0x118] sm:$0xff]   ;;  %v2464_v8 = vld [vmem:[%s3060_s3 + $0xc0] sm:$0xff]  }
  0x24   : > { %2160 = vmatpush3.bf16.msra.mxu1 %v2453_v36  ;;  %v2765_v9 = vld [vmem:[%s3060_s3 + $0x150] sm:$0xff]   ;;  %v2465_v10 = vld [vmem:[%s3060_s3 + $0x80] sm:$0xff]   ;;  %v2780_v12 = vld [vmem:[%s3060_s3 + $0x148] sm:$0xff]  }
  0x25   : > { %544 = vmatpush1.bf16.msra.mxu0 %v2388_v14  ;;  %2161 = vmatprep.subr.bf16.mxu1 %v2456_v0  ;;  %v2773_v11 = vld [vmem:[%s3060_s3 + $0x110] sm:$0xff]   ;;  %v2785_v13 = vld [vmem:[%s3060_s3 + $0x108] sm:$0xff]   ;;  %v2792_v14 = vld [vmem:[%s3060_s3 + $0x140] sm:$0xff]  }
  0x26   : > { %545 = vmatprep.subr.bf16.mxu0 %v2389_v15  ;;  %v2468_v15 = vld [vmem:[%s3060_s3 + $0x78] sm:$0xff]  }
  0x28   : > { %2162 = vmatpush3.bf16.msra.mxu1 %v2457_v2 }
  0x29   : > { %546 = vmatpush1.bf16.msra.mxu0 %v2391_v16  ;;  %2163 = vmatprep.subr.bf16.mxu1 %v2460_v4  ;;  %v2800_v16 = vld [vmem:[%s3060_s3 + $0x100] sm:$0xff]  }
  0x2a   : > { %547 = vmatprep.subr.bf16.mxu0 %v2392_v17  ;;  %v281_v17 = vlaneseq  ;;  %v2478_v4 = vld [vmem:[%s3060_s3 + $0x60] sm:$0xff]  }
  0x2c   : > { %2164 = vmatpush3.bf16.msra.mxu1 %v2461_v6 }
  0x2d   : > { %548 = vmatpush2.bf16.msra.mxu0 %v2394_v18  ;;  %2165 = vmatprep.subr.bf16.mxu1 %v2464_v8  ;;  %v282_v18 = vshrl.u32 %v281_v17, 7 }
  0x2e   : > { %549 = vmatprep.subr.bf16.mxu0 %v2395_v19 }
  0x2f   : > { %v287_v19 = vsub.s32 1, %v282_v18  ;;  %v283_v20 = vsub.s32 0, %v282_v18  ;;  %v2479_v18 = vld [vmem:[%s3060_s3 + $0x20] sm:$0xff]  }
  0x30   : > { %2166 = vmatpush3.bf16.msra.mxu1 %v2465_v10 }
  0x31   : > { %550 = vmatpush2.bf16.msra.mxu0 %v2397_v21  ;;  %2215 = vmatprep.subr.bf16.mxu1 %v2468_v15  ;;  %v279_v21 = vld [vmem:[%s3059_s2] sm:$0x3] }
  0x32   : > { %551 = vmatprep.subr.bf16.mxu0 %v2398_v23  ;;  %v2807_v23 = vrot.slane %v279_v21, %v287_v19  ;;  %v2809_v24 = vrot.slane %v279_v21, %v283_v20  ;;  %v2480_v21 = vld [vmem:[%s3060_s3 + $0x58] sm:$0xff]  }
  0x35   : > { %552 = vmatpush2.bf16.msra.mxu0 %v2400_v27 }
  0x36   : > { %553 = vmatprep.subr.bf16.mxu0 %v2401_v28 }
  0x39   : > { %554 = vmatpush2.bf16.msra.mxu0 %v2403_v31 }
  0x3a   : > { %555 = vmatprep.subr.bf16.mxu0 %v2404_v32 }
  0x3d   : > { %556 = vmatpush2.bf16.msra.mxu0 %v2406_v35 }
  0x3e   : > { %557 = vmatprep.subr.bf16.mxu0 %v2407_v37 }
  0x41   : > { %558 = vmatpush2.bf16.msra.mxu0 %v2409_v38 }
  0x42   : > { %559 = vmatprep.subr.bf16.mxu0 %v2410_v39  ;;  %v2469_v39 = vld [vmem:[%s3060_s3 + $0x38] sm:$0xff]  }
  0x45   : > { %560 = vmatpush2.bf16.msra.mxu0 %v2412_v40 }
  0x46   : > { %561 = vmatprep.subr.bf16.mxu0 %v2413_v41 }
  0x49   : > { %562 = vmatpush2.bf16.msra.mxu0 %v2415_v42  ;;  %v2474_v42 = vld [vmem:[%s3060_s3 + $0x70] sm:$0xff]  }
  0x4a   : > { %2279 = vmatprep.subr.bf16.mxu0 %v2675_v43 }
  0x4c   : > { %564 = vmatmul.mubr.bf16.vlgmr.msra.gmra.mxu0 %v2416_v44 }
  0x4d   : > { %573 = vmatprep.mubr.bf16.mxu0 %v2419_v45  ;;  %2280 = vmatpush3.bf16.msra.mxu0 %v2682_v46 }
  0x4e   : > { %2281 = vmatprep.subr.bf16.mxu0 %v2687_v47 }
  0x51   : > { %2282 = vmatpush3.bf16.msra.mxu0 %v2693_v48 }
  0x52   : > { %2283 = vmatprep.subr.bf16.mxu0 %v2698_v49 }
  0x54   : > { %574 = vmatmul.mubr.bf16.gmra.mxu0 %v2421_v50 }
  0x55   : > { %583 = vmatprep.mubr.bf16.mxu0 %v2422_v51  ;;  %2284 = vmatpush3.bf16.msra.mxu0 %v2708_v52 }
  0x56   : > { %2285 = vmatprep.subr.bf16.mxu0 %v2729_v1 }
  0x59   : > { %2286 = vmatpush3.bf16.msra.mxu0 %v2737_v3 }
  0x5a   : > { %2287 = vmatprep.subr.bf16.mxu0 %v2747_v5 }
  0x5c   : > { %584 = vmatmul.mubr.bf16.gmra.mxu0 %v2424_v53 }
  0x5d   : > { %593 = vmatprep.mubr.bf16.mxu0 %v2425_v54  ;;  %2288 = vmatpush3.bf16.msra.mxu0 %v2755_v7  ;;  %v2475_v54 = vld [vmem:[%s3060_s3 + $0x30] sm:$0xff]  }
  0x5e   : > { %2289 = vmatprep.subr.bf16.mxu0 %v2765_v9 }
  0x61   : > { %2290 = vmatpush3.bf16.msra.mxu0 %v2773_v11 }
  0x62   : > { %2291 = vmatprep.subr.bf16.mxu0 %v2780_v12 }
  0x64   : > { %594 = vmatmul.mubr.bf16.gmra.mxu0 %v2427_v55 }
  0x65   : > { %603 = vmatprep.mubr.bf16.mxu0 %v2428_v56  ;;  %2292 = vmatpush3.bf16.msra.mxu0 %v2785_v13 }
  0x66   : > { %2293 = vmatprep.subr.bf16.mxu0 %v2792_v14 }
  0x69   : > { %2294 = vmatpush3.bf16.msra.mxu0 %v2800_v16 }
  0x6c   : > { %604 = vmatmul.mubr.bf16.gmra.mxu0 %v2430_v57  ;;  %v2476_v57 = vld [vmem:[%s3060_s3 + $0x68] sm:$0xff]  }
  0x6d   : > { %613 = vmatprep.mubr.bf16.mxu0 %v2431_v58 }
  0x74   : > { %614 = vmatmul.mubr.bf16.gmra.mxu0 %v2433_v59 }
  0x75   : > { %623 = vmatprep.mubr.bf16.mxu0 %v2434_v60 }
  0x7c   : > { %624 = vmatmul.mubr.bf16.gmra.mxu0 %v2436_v61 }
  0x7d   : > { %633 = vmatprep.mubr.bf16.mxu0 %v2437_v62 }
  0x84   : > { %634 = vmatmul.mubr.bf16.gmra.mxu0 %v2439_v63  ;;  %v2477_v63 = vld [vmem:[%s3060_s3 + $0x28] sm:$0xff]  }
 0x10c   : > { %v565_v22 = vpop.f32.mrf.mxu0 }
 0x10d   : > { %v566_v29 = vadd.f32 %v565_v22, %v2809_v24 }
 0x10e   : > { %v567_v25 = vpop.f32.mrf.mxu0 }
 0x10f   : > { %v568_v27 = vadd.f32 %v567_v25, %v2807_v23  ;;  %v644_v36 = vmax.f32 %v566_v29, 0.0  ;;  %v2481_v29 = vld [vmem:[%s3060_s3 + $0x18] sm:$0xff]  }
 0x110   : > { %v569_v26 = vpop.f32.mrf.mxu0 }
 0x111   : > { %v570_v28 = vadd.f32 %v569_v26, %v2809_v24  ;;  %v645_v34 = vmax.f32 %v568_v27, 0.0 }
 0x112   : > { %v571_v30 = vpop.f32.mrf.mxu0 }
 0x113   : > { %v572_v31 = vadd.f32 %v571_v30, %v2807_v23  ;;  %v646_v32 = vmax.f32 %v570_v28, 0.0 }
 0x114   : > { %v575_v33 = vpop.f32.mrf.mxu0 }
 0x115   : > { %v647_v35 = vmax.f32 %v572_v31, 0.0  ;;  %v2820_v40 = vpack.c.bf16 %v646_v32, %v644_v36  ;;  %v576_v50 = vadd.f32 %v575_v33, %v2809_v24  ;;  %v2482_v32 = vld [vmem:[%s3060_s3 + $0x50] sm:$0xff]  }
 0x116   : > { %v577_v37 = vpop.f32.mrf.mxu0 }
 0x117   : > { %v2815_v38 = vpack.c.bf16 %v647_v35, %v645_v34  ;;  %v578_v44 = vadd.f32 %v577_v37, %v2807_v23  ;;  %v648_v60 = vmax.f32 %v576_v50, 0.0 }
 0x118   : > { %v579_v41 = vpop.f32.mrf.mxu0 }
 0x119   : > { %v580_v45 = vadd.f32 %v579_v41, %v2809_v24  ;;  %1094 = vmatprep.mubr.bf16.mxu1 %v2815_v38  ;;  %v649_v58 = vmax.f32 %v578_v44, 0.0  ;;  %v2484_v44 = vld [vmem:[%s3060_s3 + $0x48] sm:$0xff]  }
 0x11a   : > { %v581_v51 = vpop.f32.mrf.mxu0  ;;  %1095 = vmatmul.mubr.bf16.vlgmr.msra.gmra.mxu1 %v2820_v40 }
 0x11b   : > { %v582_v53 = vadd.f32 %v581_v51, %v2807_v23  ;;  %2216 = vmatpush3.bf16.msra.mxu1 %v2469_v39  ;;  %v650_v55 = vmax.f32 %v580_v45, 0.0  ;;  %v2483_v39 = vld [vmem:[%s3060_s3 + $0x10] sm:$0xff]  }
 0x11c   : > { %v585_v56 = vpop.f32.mrf.mxu0  ;;  %2217 = vmatprep.subr.bf16.mxu1 %v2474_v42 }
 0x11d   : > { %v651_v59 = vmax.f32 %v582_v53, 0.0  ;;  %v2842_v0 = vpack.c.bf16 %v650_v55, %v648_v60  ;;  %v586_v10 = vadd.f32 %v585_v56, %v2809_v24  ;;  %v2485_v55 = vld [vmem:[%s3060_s3 + $0x8] sm:$0xff]  }
 0x11e   : > { %v587_v61 = vpop.f32.mrf.mxu0 }
 0x11f   : > { %v2837_v62 = vpack.c.bf16 %v651_v59, %v649_v58  ;;  %2218 = vmatpush3.bf16.msra.mxu1 %v2475_v54  ;;  %v588_v6 = vadd.f32 %v587_v61, %v2807_v23  ;;  %v652_v26 = vmax.f32 %v586_v10, 0.0  ;;  %v2486_v58 = vld [vmem:[%s3060_s3 + $0x40] sm:$0xff]  }
 0x120   : > { %v589_v2 = vpop.f32.mrf.mxu0  ;;  %2219 = vmatprep.subr.bf16.mxu1 %v2476_v57 }
 0x121   : > { %v590_v8 = vadd.f32 %v589_v2, %v2809_v24  ;;  %1102 = vmatprep.mubr.bf16.mxu1 %v2837_v62  ;;  %1690 = vmatprep.mubr.bf16.mxu0 %v2837_v62  ;;  %v653_v22 = vmax.f32 %v588_v6, 0.0 }
 0x122   : > { %v591_v15 = vpop.f32.mrf.mxu0  ;;  %1103 = vmatmul.mubr.bf16.gmra.mxu1 %v2842_v0  ;;  %1691 = vmatmul.mubr.bf16.vlgmr.msra.gmra.mxu0 %v2842_v0 }
 0x123   : > { %v592_v17 = vadd.f32 %v591_v15, %v2807_v23  ;;  %2220 = vmatpush3.bf16.msra.mxu1 %v2477_v63  ;;  %v654_v19 = vmax.f32 %v590_v8, 0.0 }
 0x124   : > { %v595_v20 = vpop.f32.mrf.mxu0  ;;  %2221 = vmatprep.subr.bf16.mxu1 %v2478_v4  ;;  %v2487_v4 = vld [vmem:[%s3060_s3] sm:$0xff]  }
 0x125   : > { %v655_v25 = vmax.f32 %v592_v17, 0.0  ;;  %v2866_v30 = vpack.c.bf16 %v654_v19, %v652_v26  ;;  %v596_v35 = vadd.f32 %v595_v20, %v2809_v24 }
 0x126   : > { %v597_v27 = vpop.f32.mrf.mxu0 }
 0x127   : > { %v2861_v28 = vpack.c.bf16 %v655_v25, %v653_v22  ;;  %2222 = vmatpush3.bf16.msra.mxu1 %v2479_v18  ;;  %v598_v33 = vadd.f32 %v597_v27, %v2807_v23  ;;  %v656_v51 = vmax.f32 %v596_v35, 0.0 }
 0x128   : > { %v599_v31 = vpop.f32.mrf.mxu0  ;;  %2223 = vmatprep.subr.bf16.mxu1 %v2480_v21 }
 0x129   : > { %v600_v34 = vadd.f32 %v599_v31, %v2809_v24  ;;  %1110 = vmatprep.mubr.bf16.mxu1 %v2861_v28  ;;  %1698 = vmatprep.mubr.bf16.mxu0 %v2861_v28  ;;  %v657_v45 = vmax.f32 %v598_v33, 0.0 }
 0x12a   : > { %v601_v36 = vpop.f32.mrf.mxu0  ;;  %1111 = vmatmul.mubr.bf16.gmra.mxu1 %v2866_v30  ;;  %1699 = vmatmul.mubr.bf16.gmra.mxu0 %v2866_v30 }
 0x12b   : > { %v602_v37 = vadd.f32 %v601_v36, %v2807_v23  ;;  %2224 = vmatpush3.bf16.msra.mxu1 %v2481_v29  ;;  %v658_v41 = vmax.f32 %v600_v34, 0.0 }
 0x12c   : > { %v605_v42 = vpop.f32.mrf.mxu0  ;;  %2225 = vmatprep.subr.bf16.mxu1 %v2482_v32 }
 0x12d   : > { %v659_v50 = vmax.f32 %v602_v37, 0.0  ;;  %v2890_v56 = vpack.c.bf16 %v658_v41, %v656_v51  ;;  %v606_v61 = vadd.f32 %v605_v42, %v2809_v24 }
 0x12e   : > { %v607_v53 = vpop.f32.mrf.mxu0 }
 0x12f   : > { %v2885_v54 = vpack.c.bf16 %v659_v50, %v657_v45  ;;  %2226 = vmatpush3.bf16.msra.mxu1 %v2483_v39  ;;  %v608_v59 = vadd.f32 %v607_v53, %v2807_v23  ;;  %v660_v17 = vmax.f32 %v606_v61, 0.0 }
 0x130   : > { %v609_v57 = vpop.f32.mrf.mxu0  ;;  %2227 = vmatprep.subr.bf16.mxu1 %v2484_v44 }
 0x131   : > { %v610_v60 = vadd.f32 %v609_v57, %v2809_v24  ;;  %1118 = vmatprep.mubr.bf16.mxu1 %v2885_v54  ;;  %1706 = vmatprep.mubr.bf16.mxu0 %v2885_v54  ;;  %v661_v10 = vmax.f32 %v608_v59, 0.0 }
 0x132   : > { %v611_v63 = vpop.f32.mrf.mxu0  ;;  %1119 = vmatmul.mubr.bf16.gmra.mxu1 %v2890_v56  ;;  %1707 = vmatmul.mubr.bf16.gmra.mxu0 %v2890_v56 }
 0x133   : > { %v612_v2 = vadd.f32 %v611_v63, %v2807_v23  ;;  %2228 = vmatpush3.bf16.msra.mxu1 %v2485_v55  ;;  %v662_v6 = vmax.f32 %v610_v60, 0.0 }
 0x134   : > { %v615_v8 = vpop.f32.mrf.mxu0  ;;  %2229 = vmatprep.subr.bf16.mxu1 %v2486_v58 }
 0x135   : > { %v663_v15 = vmax.f32 %v612_v2, 0.0  ;;  %v2908_v20 = vpack.c.bf16 %v662_v6, %v660_v17  ;;  %v616_v26 = vadd.f32 %v615_v8, %v2809_v24 }
 0x136   : > { %v617_v18 = vpop.f32.mrf.mxu0 }
 0x137   : > { %v2906_v19 = vpack.c.bf16 %v663_v15, %v661_v10  ;;  %2230 = vmatpush3.bf16.msra.mxu1 %v2487_v4  ;;  %v618_v22 = vadd.f32 %v617_v18, %v2807_v23  ;;  %v664_v34 = vmax.f32 %v616_v26, 0.0 }
 0x138   : > { %v619_v21 = vpop.f32.mrf.mxu0  ;;  %2343 = vmatprep.subr.bf16.mxu1 %v2675_v43 }
 0x139   : > { %v620_v25 = vadd.f32 %v619_v21, %v2809_v24  ;;  %1126 = vmatprep.mubr.bf16.mxu1 %v2906_v19  ;;  %1714 = vmatprep.mubr.bf16.mxu0 %v2906_v19  ;;  %v665_v43 = vmax.f32 %v618_v22, 0.0 }
 0x13a   : > { %v621_v27 = vpop.f32.mrf.mxu0  ;;  %1127 = vmatmul.mubr.bf16.gmra.mxu1 %v2908_v20  ;;  %1715 = vmatmul.mubr.bf16.gmra.mxu0 %v2908_v20 }
 0x13b   : > { %v622_v29 = vadd.f32 %v621_v27, %v2807_v23  ;;  %v666_v31 = vmax.f32 %v620_v25, 0.0  ;;  %v2496_v25 = vmov 0  }
 0x13c   : > { %v625_v32 = vpop.f32.mrf.mxu0  ;;  %v2019_v26 = vcombine.high %v2496_v25, %v2496_v25 }
 0x13d   : > { %v667_v33 = vmax.f32 %v622_v29, 0.0  ;;  %v2921_v37 = vpack.c.bf16 %v666_v31, %v664_v34  ;;  %v626_v44 = vadd.f32 %v625_v32, %v2809_v24  ;;  %v2018_v29 = vcombine.low %v2496_v25, %v2496_v25 }
 0x13e   : > { %v627_v35 = vpop.f32.mrf.mxu0 }
 0x13f   : > { %v2919_v36 = vpack.c.bf16 %v667_v33, %v665_v43  ;;  %v628_v41 = vadd.f32 %v627_v35, %v2807_v23  ;;  %v668_v58 = vmax.f32 %v626_v44, 0.0 }
 0x140   : > { %v629_v39 = vpop.f32.mrf.mxu0 }
 0x141   : > { %v630_v42 = vadd.f32 %v629_v39, %v2809_v24  ;;  %1134 = vmatprep.mubr.bf16.mxu1 %v2919_v36  ;;  %1722 = vmatprep.mubr.bf16.mxu0 %v2919_v36  ;;  %v669_v55 = vmax.f32 %v628_v41, 0.0 }
 0x142   : > { %v631_v45 = vpop.f32.mrf.mxu0  ;;  %1135 = vmatmul.mubr.bf16.gmra.mxu1 %v2921_v37  ;;  %1723 = vmatmul.mubr.bf16.gmra.mxu0 %v2921_v37 }
 0x143   : > { %v632_v50 = vadd.f32 %v631_v45, %v2807_v23  ;;  %v670_v51 = vmax.f32 %v630_v42, 0.0 }
 0x144   : > { %v635_v53 = vpop.f32.mrf.mxu0 }
 0x145   : > { %v671_v57 = vmax.f32 %v632_v50, 0.0  ;;  %v2147_v61 = vpack.c.bf16 %v670_v51, %v668_v58  ;;  %v636_v6 = vadd.f32 %v635_v53, %v2809_v24 }
 0x146   : > { %v637_v59 = vpop.f32.mrf.mxu0 }
 0x147   : > { %v2148_v60 = vpack.c.bf16 %v671_v57, %v669_v55  ;;  %v638_v2 = vadd.f32 %v637_v59, %v2807_v23  ;;  %v672_v21 = vmax.f32 %v636_v6, 0.0 }
 0x148   : > { %v639_v63 = vpop.f32.mrf.mxu0 }
 0x149   : > { %v640_v4 = vadd.f32 %v639_v63, %v2809_v24  ;;  %1142 = vmatprep.mubr.bf16.mxu1 %v2148_v60  ;;  %1730 = vmatprep.mubr.bf16.mxu0 %v2148_v60  ;;  %v673_v17 = vmax.f32 %v638_v2, 0.0 }
 0x14a   : > { %v641_v8 = vpop.f32.mrf.mxu0  ;;  %1143 = vmatmul.mubr.bf16.gmra.mxu1 %v2147_v61  ;;  %1731 = vmatmul.mubr.bf16.gmra.mxu0 %v2147_v61 }
 0x14b   : > { %v642_v10 = vadd.f32 %v641_v8, %v2807_v23  ;;  %v674_v15 = vmax.f32 %v640_v4, 0.0 }
 0x14d   : > { %v675_v18 = vmax.f32 %v642_v10, 0.0  ;;  %v2149_v27 = vpack.c.bf16 %v674_v15, %v672_v21 }
 0x14f   : > { %v2150_v22 = vpack.c.bf16 %v675_v18, %v673_v17 }
 0x151   : > { %1150 = vmatprep.mubr.bf16.mxu1 %v2150_v22 }
 0x152   : > { %1151 = vmatmul.mubr.bf16.gmra.mxu1 %v2149_v27 }
 0x153   : > { %1367 = vmatprep.mubr.bf16.mxu1 %v2019_v26 }
 0x15a   : > { %1368 = vmatmul.mubr.bf16.vlgmr.msra.gmra.mxu1 %v2018_v29 }
 0x15b   : > { %2351 = vmatpush3.bf16.msra.mxu1 %v2682_v46  ;;  %1375 = vmatprep.mubr.bf16.mxu1 %v2815_v38 }
 0x15c   : > { %2344 = vmatprep.subr.bf16.mxu1 %v2687_v47 }
 0x15f   : > { %2352 = vmatpush3.bf16.msra.mxu1 %v2693_v48 }
 0x160   : > { %2345 = vmatprep.subr.bf16.mxu1 %v2698_v49 }
 0x162   : > { %1376 = vmatmul.mubr.bf16.gmra.mxu1 %v2820_v40 }
 0x163   : > { %1383 = vmatprep.mubr.bf16.mxu1 %v2837_v62  ;;  %2353 = vmatpush3.bf16.msra.mxu1 %v2708_v52 }
 0x164   : > { %2346 = vmatprep.subr.bf16.mxu1 %v2729_v1 }
 0x167   : > { %2354 = vmatpush3.bf16.msra.mxu1 %v2737_v3 }
 0x168   : > { %2347 = vmatprep.subr.bf16.mxu1 %v2747_v5 }
 0x16a   : > { %1384 = vmatmul.mubr.bf16.gmra.mxu1 %v2842_v0 }
 0x16b   : > { %1391 = vmatprep.mubr.bf16.mxu1 %v2861_v28  ;;  %2355 = vmatpush3.bf16.msra.mxu1 %v2755_v7 }
 0x16c   : > { %2348 = vmatprep.subr.bf16.mxu1 %v2765_v9 }
 0x16f   : > { %2356 = vmatpush3.bf16.msra.mxu1 %v2773_v11 }
 0x170   : > { %2349 = vmatprep.subr.bf16.mxu1 %v2780_v12 }
 0x172   : > { %1392 = vmatmul.mubr.bf16.gmra.mxu1 %v2866_v30 }
 0x173   : > { %1399 = vmatprep.mubr.bf16.mxu1 %v2885_v54  ;;  %2357 = vmatpush3.bf16.msra.mxu1 %v2785_v13 }
 0x174   : > { %2350 = vmatprep.subr.bf16.mxu1 %v2792_v14 }
 0x177   : > { %2358 = vmatpush3.bf16.msra.mxu1 %v2800_v16 }
 0x17a   : > { %1400 = vmatmul.mubr.bf16.gmra.mxu1 %v2890_v56 }
 0x17b   : > { %1407 = vmatprep.mubr.bf16.mxu1 %v2906_v19 }
 0x182   : > { %1408 = vmatmul.mubr.bf16.gmra.mxu1 %v2908_v20 }
 0x183   : > { %1415 = vmatprep.mubr.bf16.mxu1 %v2919_v36 }
 0x18a   : > { %1416 = vmatmul.mubr.bf16.gmra.mxu1 %v2921_v37 }
 0x18b   : > { %1423 = vmatprep.mubr.bf16.mxu1 %v2148_v60 }
 0x192   : > { %1424 = vmatmul.mubr.bf16.gmra.mxu1 %v2147_v61 }
 0x193   : > { %1738 = vmatprep.mubr.bf16.mxu1 %v2150_v22 }
 0x19a   : > { %1739 = vmatmul.mubr.bf16.vlgmr.msra.gmra.mxu1 %v2149_v27 }
 0x19b   : > { %1746 = vmatprep.mubr.bf16.mxu1 %v2019_v26 }
 0x1a2   : > { %1747 = vmatmul.mubr.bf16.gmra.mxu1 %v2018_v29 }
 0x1da   : > { %v2167_v46 = vpop.f32.mrf.mxu1 }
 0x1dc   : > { %v2168_v47 = vpop.f32.mrf.mxu1 }
 0x1dd   : > { %v2962_v48 = vadd.f32 %v2168_v47, %v2167_v46 }
 0x1de   : > { %v2170_v49 = vpop.f32.mrf.mxu1 }
 0x1e0   : > { %v2171_v52 = vpop.f32.mrf.mxu1 }
 0x1e1   : > { %v2964_v1 = vadd.f32 %v2171_v52, %v2170_v49 }
 0x1e2   : > { %v2173_v3 = vpop.f32.mrf.mxu1  ;;  %v2295_v14 = vpop.f32.mrf.mxu0 }
 0x1e4   : > { %v2174_v5 = vpop.f32.mrf.mxu1  ;;  %v2296_v38 = vpop.f32.mrf.mxu0 }
 0x1e5   : > { %v2966_v7 = vadd.f32 %v2174_v5, %v2173_v3  ;;  %v2297_v47 = vadd.f32 %v2296_v38, %v2295_v14  ;;  %v2998_v3 = vld [vmem:[%s3061_s4] ss:$0 sm:$0xff] }
 0x1e6   : > { %v2176_v9 = vpop.f32.mrf.mxu1  ;;  %v2298_v28 = vpop.f32.mrf.mxu0 }
 0x1e8   : > { %v2177_v11 = vpop.f32.mrf.mxu1  ;;  %v2299_v19 = vpop.f32.mrf.mxu0 }
 0x1e9   : > { %v2968_v12 = vadd.f32 %v2177_v11, %v2176_v9 }
 0x1ea   : > { %v2179_v13 = vpop.f32.mrf.mxu1  ;;  %v2301_v43 = vpop.f32.mrf.mxu0 }
 0x1ec   : > { %v2180_v16 = vpop.f32.mrf.mxu1  ;;  %v2302_v36 = vpop.f32.mrf.mxu0 }
 0x1ed   : > { %v2970_v23 = vadd.f32 %v2180_v16, %v2179_v13  ;;  %v2300_v16 = vadd.f32 %v2299_v19, %v2298_v28 }
 0x1ee   : > { %v2182_v24 = vpop.f32.mrf.mxu1  ;;  %v2304_v42 = vpop.f32.mrf.mxu0 }
 0x1f0   : > { %v2183_v40 = vpop.f32.mrf.mxu1  ;;  %v2305_v51 = vpop.f32.mrf.mxu0 }
 0x1f1   : > { %v2972_v62 = vadd.f32 %v2183_v40, %v2182_v24 }
 0x1f2   : > { %v2185_v0 = vpop.f32.mrf.mxu1  ;;  %v2307_v58 = vpop.f32.mrf.mxu0 }
 0x1f4   : > { %v2186_v30 = vpop.f32.mrf.mxu1  ;;  %v2308_v63 = vpop.f32.mrf.mxu0 }
 0x1f5   : > { %v2974_v54 = vadd.f32 %v2186_v30, %v2185_v0 }
 0x1f6   : > { %v2188_v56 = vpop.f32.mrf.mxu1  ;;  %v2310_v8 = vpop.f32.mrf.mxu0 }
 0x1f8   : > { %v2189_v20 = vpop.f32.mrf.mxu1  ;;  %v2311_v18 = vpop.f32.mrf.mxu0 }
 0x1f9   : > { %v2976_v31 = vadd.f32 %v2189_v20, %v2188_v56  ;;  %v2303_v20 = vadd.f32 %v2302_v36, %v2301_v43 }
 0x1fa   : > { %v2191_v32 = vpop.f32.mrf.mxu1  ;;  %v2313_v26 = vpop.f32.mrf.mxu0 }
 0x1fc   : > { %v2192_v33 = vpop.f32.mrf.mxu1  ;;  %v2314_v52 = vpop.f32.mrf.mxu0 }
 0x1fd   : > { %v2978_v34 = vadd.f32 %v2192_v33, %v2191_v32 }
 0x1fe   : > { %v2194_v35 = vpop.f32.mrf.mxu1 }
 0x200   : > { %v2195_v37 = vpop.f32.mrf.mxu1 }
 0x201   : > { %v2980_v39 = vadd.f32 %v2195_v37, %v2194_v35 }
 0x202   : > { %v2197_v41 = vpop.f32.mrf.mxu1 }
 0x204   : > { %v2198_v44 = vpop.f32.mrf.mxu1 }
 0x205   : > { %v2982_v45 = vadd.f32 %v2198_v44, %v2197_v41  ;;  %v2306_v44 = vadd.f32 %v2305_v51, %v2304_v42 }
 0x206   : > { %v2200_v50 = vpop.f32.mrf.mxu1 }
 0x208   : > { %v2201_v53 = vpop.f32.mrf.mxu1 }
 0x209   : > { %v2984_v55 = vadd.f32 %v2201_v53, %v2200_v50 }
 0x20a   : > { %v2203_v57 = vpop.f32.mrf.mxu1 }
 0x20c   : > { %v2204_v59 = vpop.f32.mrf.mxu1 }
 0x20d   : > { %v2986_v60 = vadd.f32 %v2204_v59, %v2203_v57 }
 0x20e   : > { %v2206_v61 = vpop.f32.mrf.mxu1 }
 0x210   : > { %v2207_v2 = vpop.f32.mrf.mxu1 }
 0x211   : > { %v2988_v4 = vadd.f32 %v2207_v2, %v2206_v61  ;;  %v2309_v2 = vadd.f32 %v2308_v63, %v2307_v58 }
 0x212   : > { %v2209_v6 = vpop.f32.mrf.mxu1 }
 0x214   : > { %v2210_v10 = vpop.f32.mrf.mxu1 }
 0x215   : > { %v2990_v15 = vadd.f32 %v2210_v10, %v2209_v6 }
 0x216   : > { %v2212_v17 = vpop.f32.mrf.mxu1 }
 0x218   : > { %v2213_v21 = vpop.f32.mrf.mxu1 }
 0x219   : > { %v2992_v22 = vadd.f32 %v2213_v21, %v2212_v17 }
 0x21a   : > { %v2231_v25 = vpop.f32.mrf.mxu1 }
 0x21c   : > { %v2232_v27 = vpop.f32.mrf.mxu1 }
 0x21d   : > { %v2233_v29 = vadd.f32 %v2232_v27, %v2231_v25  ;;  %v2312_v27 = vadd.f32 %v2311_v18, %v2310_v8 }
 0x21e   : > { %v2234_v46 = vpop.f32.mrf.mxu1 }
 0x21f   : > { %v1370_v49 = vadd.f32 %v2233_v29, %v2962_v48  ;;  %v2316_v48 = vpop.f32.mrf.mxu0 }
 0x220   : > { %v2235_v5 = vpop.f32.mrf.mxu1 }
 0x221   : > { %v1755_v9 = vadd.f32 %v2297_v47, %v1370_v49  ;;  %v2236_v11 = vadd.f32 %v2235_v5, %v2234_v46  ;;  %v2317_v19 = vpop.f32.mrf.mxu0 }
 0x222   : > { %v2237_v13 = vpop.f32.mrf.mxu1 }
 0x223   : > { %v1778_v24 = vadd.f32 %v2998_v3, %v1755_v9  ;;  %v1373_v40 = vadd.f32 %v2236_v11, %v2964_v1  ;;  %v2319_v57 = vpop.f32.mrf.mxu0  ;;  %v2315_v9 = vadd.f32 %v2314_v52, %v2313_v26 }
 0x224   : > { %v2238_v14 = vpop.f32.mrf.mxu1 }
 0x225   : > { %v1794_v38 = vmax.f32 %v1778_v24, 0.0  ;;  %v1756_v0 = vadd.f32 %v2300_v16, %v1373_v40  ;;  %v2239_v30 = vadd.f32 %v2238_v14, %v2237_v13  ;;  %v2320_v17 = vpop.f32.mrf.mxu0  ;;  %v2318_v14 = vadd.f32 %v2317_v19, %v2316_v48 }
 0x226   : > { %v2240_v56 = vpop.f32.mrf.mxu1 }
 0x227   : > { %1810 = vst [vmem:[%s3007_s13] sm:$0xff] %v1794_v38  ;;  %v1779_v28 = vadd.f32 %v2998_v3, %v1756_v0  ;;  %v1378_v1 = vadd.f32 %v2239_v30, %v2966_v7  ;;  %v2322_v47 = vpop.f32.mrf.mxu0 }
 0x228   : > { %v2241_v32 = vpop.f32.mrf.mxu1 }
 0x229   : > { %v1795_v33 = vmax.f32 %v1779_v28, 0.0  ;;  %v1757_v35 = vadd.f32 %v2303_v20, %v1378_v1  ;;  %v2242_v37 = vadd.f32 %v2241_v32, %v2240_v56  ;;  %v2323_v16 = vpop.f32.mrf.mxu0  ;;  %v2321_v28 = vadd.f32 %v2320_v17, %v2319_v57 }
 0x22a   : > { %v2243_v41 = vpop.f32.mrf.mxu1 }
 0x22b   : > { %1811 = vst [vmem:[%s3007_s13 + $0x8] sm:$0xff] %v1795_v33  ;;  %v1780_v50 = vadd.f32 %v2998_v3, %v1757_v35  ;;  %v1381_v53 = vadd.f32 %v2242_v37, %v2968_v12  ;;  %v2325_v30 = vpop.f32.mrf.mxu0 }
 0x22c   : > { %v2244_v43 = vpop.f32.mrf.mxu1 }
 0x22d   : > { %v1796_v36 = vmax.f32 %v1780_v50, 0.0  ;;  %v1758_v59 = vadd.f32 %v2306_v44, %v1381_v53  ;;  %v2245_v61 = vadd.f32 %v2244_v43, %v2243_v41  ;;  %v2326_v33 = vpop.f32.mrf.mxu0  ;;  %v2324_v41 = vadd.f32 %v2323_v16, %v2322_v47 }
 0x22e   : > { %v2246_v7 = vpop.f32.mrf.mxu1 }
 0x22f   : > { %1812 = vst [vmem:[%s3007_s13 + $0x10] sm:$0xff] %v1796_v36  ;;  %v1781_v6 = vadd.f32 %v2998_v3, %v1758_v59  ;;  %v1386_v10 = vadd.f32 %v2245_v61, %v2970_v23  ;;  %v2328_v53 = vpop.f32.mrf.mxu0  ;;  %v2327_v61 = vadd.f32 %v2326_v33, %v2325_v30 }
 0x230   : > { %v2247_v42 = vpop.f32.mrf.mxu1 }
 0x231   : > { %v1797_v51 = vmax.f32 %v1781_v6, 0.0  ;;  %v1759_v21 = vadd.f32 %v2309_v2, %v1386_v10  ;;  %v2248_v25 = vadd.f32 %v2247_v42, %v2246_v7  ;;  %v2329_v6 = vpop.f32.mrf.mxu0 }
 0x232   : > { %v2249_v12 = vpop.f32.mrf.mxu1 }
 0x233   : > { %1813 = vst [vmem:[%s3007_s13 + $0x18] sm:$0xff] %v1797_v51  ;;  %v1782_v29 = vadd.f32 %v2998_v3, %v1759_v21  ;;  %v1389_v46 = vadd.f32 %v2248_v25, %v2972_v62  ;;  %v2330_v21 = vadd.f32 %v2329_v6, %v2328_v53 }
 0x234   : > { %v2250_v58 = vpop.f32.mrf.mxu1 }
 0x235   : > { %v1798_v63 = vmax.f32 %v1782_v29, 0.0  ;;  %v1760_v49 = vadd.f32 %v2312_v27, %v1389_v46  ;;  %v2251_v5 = vadd.f32 %v2250_v58, %v2249_v12 }
 0x236   : > { %v2252_v23 = vpop.f32.mrf.mxu1 }
 0x237   : > { %1814 = vst [vmem:[%s3007_s13 + $0x20] sm:$0xff] %v1798_v63  ;;  %v1783_v11 = vadd.f32 %v2998_v3, %v1760_v49  ;;  %v1394_v13 = vadd.f32 %v2251_v5, %v2974_v54 }
 0x238   : > { %v2253_v8 = vpop.f32.mrf.mxu1 }
 0x239   : > { %v1799_v18 = vmax.f32 %v1783_v11, 0.0  ;;  %v1761_v24 = vadd.f32 %v2315_v9, %v1394_v13  ;;  %v2254_v40 = vadd.f32 %v2253_v8, %v2252_v23 }
 0x23a   : > { %v2255_v62 = vpop.f32.mrf.mxu1 }
 0x23b   : > { %1815 = vst [vmem:[%s3007_s13 + $0x28] sm:$0xff] %v1799_v18  ;;  %v1784_v38 = vadd.f32 %v2998_v3, %v1761_v24  ;;  %v1397_v0 = vadd.f32 %v2254_v40, %v2976_v31 }
 0x23c   : > { %v2256_v26 = vpop.f32.mrf.mxu1 }
 0x23d   : > { %v1800_v52 = vmax.f32 %v1784_v38, 0.0  ;;  %v1762_v56 = vadd.f32 %v2318_v14, %v1397_v0  ;;  %v2257_v20 = vadd.f32 %v2256_v26, %v2255_v62 }
 0x23e   : > { %v2258_v54 = vpop.f32.mrf.mxu1 }
 0x23f   : > { %1816 = vst [vmem:[%s3007_s13 + $0x30] sm:$0xff] %v1800_v52  ;;  %v1785_v1 = vadd.f32 %v2998_v3, %v1762_v56  ;;  %v1402_v32 = vadd.f32 %v2257_v20, %v2978_v34 }
 0x240   : > { %v2259_v48 = vpop.f32.mrf.mxu1 }
 0x241   : > { %v1801_v19 = vmax.f32 %v1785_v1, 0.0  ;;  %v1763_v35 = vadd.f32 %v2321_v28, %v1402_v32  ;;  %v2260_v37 = vadd.f32 %v2259_v48, %v2258_v54 }
 0x242   : > { %v2261_v31 = vpop.f32.mrf.mxu1 }
 0x243   : > { %1817 = vst [vmem:[%s3007_s13 + $0x38] sm:$0xff] %v1801_v19  ;;  %v1786_v44 = vadd.f32 %v2998_v3, %v1763_v35  ;;  %v1405_v50 = vadd.f32 %v2260_v37, %v2980_v39 }
 0x244   : > { %v2262_v57 = vpop.f32.mrf.mxu1 }
 0x245   : > { %v1802_v43 = vmax.f32 %v1786_v44, 0.0  ;;  %v1764_v36 = vadd.f32 %v2324_v41, %v1405_v50  ;;  %v2263_v59 = vadd.f32 %v2262_v57, %v2261_v31 }
 0x246   : > { %v2264_v34 = vpop.f32.mrf.mxu1 }
 0x247   : > { %1818 = vst [vmem:[%s3007_s13 + $0x40] sm:$0xff] %v1802_v43  ;;  %v1787_v7 = vadd.f32 %v2998_v3, %v1764_v36  ;;  %v1410_v2 = vadd.f32 %v2263_v59, %v2982_v45 }
 0x248   : > { %v2265_v10 = vpop.f32.mrf.mxu1 }
 0x249   : > { %v1803_v17 = vmax.f32 %v1787_v7, 0.0  ;;  %v1765_v42 = vadd.f32 %v2327_v61, %v1410_v2  ;;  %v2266_v39 = vadd.f32 %v2265_v10, %v2264_v34 }
 0x24a   : > { %v2267_v51 = vpop.f32.mrf.mxu1 }
 0x24b   : > { %1819 = vst [vmem:[%s3007_s13 + $0x48] sm:$0xff] %v1803_v17  ;;  %v1788_v25 = vadd.f32 %v2998_v3, %v1765_v42  ;;  %v1413_v12 = vadd.f32 %v2266_v39, %v2984_v55 }
 0x24c   : > { %v2268_v27 = vpop.f32.mrf.mxu1 }
 0x24d   : > { %v1804_v29 = vmax.f32 %v1788_v25, 0.0  ;;  %v1766_v46 = vadd.f32 %v2330_v21, %v1413_v12  ;;  %v2269_v11 = vadd.f32 %v2268_v27, %v2267_v51 }
 0x24e   : > { %v2270_v47 = vpop.f32.mrf.mxu1 }
 0x24f   : > { %1820 = vst [vmem:[%s3007_s13 + $0x50] sm:$0xff] %v1804_v29  ;;  %v1789_v45 = vadd.f32 %v2998_v3, %v1766_v46  ;;  %v1418_v8 = vadd.f32 %v2269_v11, %v2986_v60 }
 0x250   : > { %v2271_v58 = vpop.f32.mrf.mxu1 }
 0x251   : > { %v1805_v63 = vmax.f32 %v1789_v45, 0.0  ;;  %v2272_v55 = vadd.f32 %v2271_v58, %v2270_v47 }
 0x252   : > { %v2273_v49 = vpop.f32.mrf.mxu1 }
 0x253   : > { %1821 = vst [vmem:[%s3007_s13 + $0x58] sm:$0xff] %v1805_v63  ;;  %v1421_v14 = vadd.f32 %v2272_v55, %v2988_v4 }
 0x254   : > { %v2274_v5 = vpop.f32.mrf.mxu1 }
 0x255   : > { %v2275_v38 = vadd.f32 %v2274_v5, %v2273_v49 }
 0x256   : > { %v2276_v23 = vpop.f32.mrf.mxu1 }
 0x257   : > { %v1426_v60 = vadd.f32 %v2275_v38, %v2990_v15 }
 0x258   : > { %v2277_v9 = vpop.f32.mrf.mxu1 }
 0x259   : > { %v2278_v54 = vadd.f32 %v2277_v9, %v2276_v23 }
 0x25a   : > { %v2331_v13 = vpop.f32.mrf.mxu1 }
 0x25b   : > { %v1429_v19 = vadd.f32 %v2278_v54, %v2992_v22 }
 0x25c   : > { %v2332_v16 = vpop.f32.mrf.mxu1 }
 0x25d   : > { %v2333_v18 = vadd.f32 %v2332_v16, %v2331_v13 }
 0x25e   : > { %v2334_v24 = vpop.f32.mrf.mxu1 }
 0x25f   : > { %v1767_v40 = vadd.f32 %v2333_v18, %v1418_v8 }
 0x260   : > { %v2335_v62 = vpop.f32.mrf.mxu1 }
 0x261   : > { %v1790_v0 = vadd.f32 %v2998_v3, %v1767_v40  ;;  %v2336_v30 = vadd.f32 %v2335_v62, %v2334_v24 }
 0x262   : > { %v2337_v26 = vpop.f32.mrf.mxu1 }
 0x263   : > { %v1806_v52 = vmax.f32 %v1790_v0, 0.0  ;;  %v1768_v56 = vadd.f32 %v2336_v30, %v1421_v14 }
 0x264   : > { %v2338_v20 = vpop.f32.mrf.mxu1 }
 0x265   : > { %1822 = vst [vmem:[%s3007_s13 + $0x60] sm:$0xff] %v1806_v52  ;;  %v1791_v28 = vadd.f32 %v2998_v3, %v1768_v56  ;;  %v2339_v1 = vadd.f32 %v2338_v20, %v2337_v26 }
 0x266   : > { %v2340_v32 = vpop.f32.mrf.mxu1 }
 0x267   : > { %v1807_v4 = vmax.f32 %v1791_v28, 0.0  ;;  %v1769_v33 = vadd.f32 %v2339_v1, %v1426_v60 }
 0x268   : > { %v2341_v48 = vpop.f32.mrf.mxu1 }
 0x269   : > { %1823 = vst [vmem:[%s3007_s13 + $0x68] sm:$0xff] %v1807_v4  ;;  %v1792_v35 = vadd.f32 %v2998_v3, %v1769_v33  ;;  %v2342_v37 = vadd.f32 %v2341_v48, %v2340_v32 }
 0x26b   : > { %v1808_v31 = vmax.f32 %v1792_v35, 0.0  ;;  %v1770_v41 = vadd.f32 %v2342_v37, %v1429_v19 }
 0x26d   : > { %1824 = vst [vmem:[%s3007_s13 + $0x70] sm:$0xff] %v1808_v31  ;;  %v1793_v15 = vadd.f32 %v2998_v3, %v1770_v41 }
 0x26f   : > { %v1809_v44 = vmax.f32 %v1793_v15, 0.0 }
 0x271   : > { %1825 = vst [vmem:[%s3007_s13 + $0x78] sm:$0xff] %v1809_v44 }
 0x272 PF: > { %s15_s18 = sadd.s32 1, %s2494_s18  }
 0x273   : > { %p12_p4 = scmp.ge.s32.totalorder %s15_s18, 4  }
 0x275   :  { %14 = sbr.rel (!%p12_p4) target bundleno = 1 (0x1), region = 75 }

</bundles_post_ra>
